<compile_context>
chip_gen: v5e
topology: v5e:2x2
jax: 0.10.0
libtpu: 0.0.40
codegen_flags: <defaults>
</compile_context>

<pallas_src>
import jax
import jax.numpy as jnp
from jax.experimental import pallas as pl
from jax.experimental.pallas import tpu as pltpu


def _round_up(x: int, m: int) -> int:
    return (x + m - 1) // m * m


def _siamese_eval_kernel(x1_ref, x2_ref, wbig_ref, bb_ref,
                         wc1_ref, wc2_ref, bc_ref, out_ref):
    # x1_ref, x2_ref : (TN, CSP)  bf16  flattened (C*H*W), zero-padded inputs
    # wbig_ref       : (CSP, FP)  bf16  GAP folded into backbone weight (wb/S repeated)
    # bb_ref         : (1, FP)    f32   backbone bias (zero-padded)
    # wc1_ref,wc2_ref: (FP, KP)   f32   classifier split: cat -> sum of two matmuls
    # bc_ref         : (1, KP)    f32   classifier bias (zero-padded)
    # out_ref        : (TN, KP)   f32   lane-dense padded output

    # ---- backbone forward_once (GAP folded into the matmul) + ReLU ----
    f1 = jnp.maximum(
        jnp.dot(x1_ref[...], wbig_ref[...],
                preferred_element_type=jnp.float32) + bb_ref[...], 0.0)
    f2 = jnp.maximum(
        jnp.dot(x2_ref[...], wbig_ref[...],
                preferred_element_type=jnp.float32) + bb_ref[...], 0.0)

    # ---- classifier on concat([f1, f2], dim=1) + sigmoid ----
    # cat(f1, f2) @ Wc.T == f1 @ Wc[:, :F].T + f2 @ Wc[:, F:].T
    logits = (jnp.dot(f1, wc1_ref[...], preferred_element_type=jnp.float32)
              + jnp.dot(f2, wc2_ref[...], preferred_element_type=jnp.float32)
              + bc_ref[...])
    out_ref[...] = jax.nn.sigmoid(logits).astype(out_ref.dtype)


def classification_linear_evaluator(x1_nchw, x2_nchw, params, *, batch_tile=None):
    """Fused siamese-eval Pallas kernel. Inputs are NCHW."""
    N, C, H, W = x1_nchw.shape
    S = H * W
    CS = C * S
    F = params["wb"].shape[1]            # base_model.resnet.fc.in_features
    K = params["wc"].shape[0]            # num_classes (=1 for binary)

    # Padded (lane/sublane friendly) dims.
    CSP = _round_up(CS, 128)             # contraction dim, lane axis of inputs
    FP = _round_up(F, 128)               # feature dim, lane-dense intermediates
    KP = _round_up(K, 128)               # output dim, lane-dense stores

    # ---- batch tile: biggest tile within a VMEM budget safe on v5e/v6e/v7x ----
    if batch_tile is None:
        budget = 20 * 1024 * 1024        # 2 inputs x 2 pipeline buffers must fit
        tn = budget // (2 * 2 * CSP * 2)  # bf16 input rows
        tn = max(16, min(1024, (tn // 16) * 16))
    else:
        tn = _round_up(batch_tile, 16)
    tn = min(tn, _round_up(N, 16))       # don't over-pad tiny batches
    NP = _round_up(N, tn)                # ragged tail handled by zero-padding

    # ---- pack inputs: flatten NCHW -> (N, C*S), zero-pad, cast bf16 ----
    x1f = x1_nchw.reshape(N, CS).astype(jnp.bfloat16)
    x2f = x2_nchw.reshape(N, CS).astype(jnp.bfloat16)
    x1p = jnp.zeros((NP, CSP), jnp.bfloat16).at[:N, :CS].set(x1f)
    x2p = jnp.zeros((NP, CSP), jnp.bfloat16).at[:N, :CS].set(x2f)

    # ---- weights: fold GAP (mean over S) into the backbone matmul ----
    wb = params["wb"].astype(jnp.float32)                    # (C, F)
    w_big = jnp.repeat(wb / float(S), S, axis=0)             # (C*S, F), row c*S+s = wb[c]/S
    w_big_p = jnp.zeros((CSP, FP), jnp.bfloat16).at[:CS, :F].set(
        w_big.astype(jnp.bfloat16))
    bb_p = jnp.zeros((1, FP), jnp.float32).at[0, :F].set(
        params["bb"].reshape(F).astype(jnp.float32))

    wc = params["wc"].astype(jnp.float32)                    # (K, 2F) torch Linear layout
    wc1_p = jnp.zeros((FP, KP), jnp.float32).at[:F, :K].set(wc[:, :F].T)
    wc2_p = jnp.zeros((FP, KP), jnp.float32).at[:F, :K].set(wc[:, F:].T)
    bc_p = jnp.zeros((1, KP), jnp.float32).at[0, :K].set(
        params["bc"].reshape(K).astype(jnp.float32))

    out_padded = pl.pallas_call(
        _siamese_eval_kernel,
        out_shape=jax.ShapeDtypeStruct((NP, KP), jnp.float32),
        grid=(NP // tn,),
        in_specs=[
            pl.BlockSpec((tn, CSP), lambda i: (i, 0)),       # x1 tile
            pl.BlockSpec((tn, CSP), lambda i: (i, 0)),       # x2 tile
            pl.BlockSpec((CSP, FP), lambda i: (0, 0)),       # backbone weight (resident)
            pl.BlockSpec((1, FP), lambda i: (0, 0)),         # backbone bias
            pl.BlockSpec((FP, KP), lambda i: (0, 0)),        # classifier W (first half)
            pl.BlockSpec((FP, KP), lambda i: (0, 0)),        # classifier W (second half)
            pl.BlockSpec((1, KP), lambda i: (0, 0)),         # classifier bias
        ],
        out_specs=pl.BlockSpec((tn, KP), lambda i: (i, 0)),
        compiler_params=pltpu.CompilerParams(
            dimension_semantics=("parallel",),               # batch axis -> megacore/2-TC
            vmem_limit_bytes=48 * 1024 * 1024,               # < 64 MiB physical on v7x
        ),
    )(x1p, x2p, w_big_p, bb_p, wc1_p, wc2_p, bc_p)

    return out_padded[:N, :K]


def _reference(x1_nchw, x2_nchw, params):
    """Pure-JAX f32 reference of the same forward pass (unfused math)."""
    N, C, H, W = x1_nchw.shape

    def forward_once(x):
        gap = jnp.mean(x.reshape(N, C, H * W), axis=2)
        return jnp.maximum(gap @ params["wb"] + params["bb"], 0.0)

    f1 = forward_once(x1_nchw.astype(jnp.float32))
    f2 = forward_once(x2_nchw.astype(jnp.float32))
    cat = jnp.concatenate([f1, f2], axis=1)           # torch.cat(..., dim=1)
    logits = cat @ params["wc"].T + params["bc"]      # nn.Linear
    return jax.nn.sigmoid(logits)                     # nn.Sigmoid


if __name__ == "__main__":
    # Small shapes consistent with the module: batch=2, channels=4, spatial=16x16,
    # backbone feature dim (resnet.fc.in_features) = 32, num_classes=2 -> 1 output.
    N, C, H, W = 2, 4, 16, 16
    FEAT = 32
    NUM_CLASSES = 2
    K = NUM_CLASSES if NUM_CLASSES > 2 else 1

    key = jax.random.PRNGKey(0)
    k1, k2, k3, k4, k5, k6 = jax.random.split(key, 6)

    x1 = jax.random.normal(k1, (N, C, H, W), dtype=jnp.float32)
    x2 = jax.random.normal(k2, (N, C, H, W), dtype=jnp.float32)

    params = {
        # synthetic backbone projection (stand-in for frozen resnet features)
        "wb": jax.random.normal(k3, (C, FEAT), dtype=jnp.float32) * 0.1,
        "bb": jax.random.normal(k4, (FEAT,), dtype=jnp.float32) * 0.01,
        # classifier: nn.Linear(2 * in_features, num_classes-or-1), torch layout (out, in)
        "wc": jax.random.normal(k5, (K, 2 * FEAT), dtype=jnp.float32) * 0.1,
        "bc": jax.random.normal(k6, (K,), dtype=jnp.float32) * 0.01,
    }

    out = classification_linear_evaluator(x1, x2, params)
    out = jax.block_until_ready(out)

    ref = _reference(x1, x2, params)
    assert out.shape == (N, K), f"bad output shape {out.shape}"
    # bf16 activations/weights with f32 accumulation -> loose-but-tight-enough tolerance.
    assert jnp.allclose(out, ref, atol=2e-2, rtol=2e-2), "mismatch vs reference"

    print("KERNEL_OK")
</pallas_src>

<mosaic_0001>
module attributes {stable_mosaic.version = 11 : i64} {
  func.func @_siamese_eval_kernel(%arg0: i32, %arg1: memref<16x1024xbf16, #tpu.memory_space<vmem>>, %arg2: memref<16x1024xbf16, #tpu.memory_space<vmem>>, %arg3: memref<1024x128xbf16, #tpu.memory_space<vmem>>, %arg4: memref<1x128xf32, #tpu.memory_space<vmem>>, %arg5: memref<128x128xf32, #tpu.memory_space<vmem>>, %arg6: memref<128x128xf32, #tpu.memory_space<vmem>>, %arg7: memref<1x128xf32, #tpu.memory_space<vmem>>, %arg8: memref<16x128xf32, #tpu.memory_space<vmem>>) attributes {dimension_semantics = [#tpu.dimension_semantics<parallel>], iteration_bounds = array<i64: 1>, scalar_prefetch = 0 : i64, scratch_operands = 0 : i64, tpu.core_type = #tpu.core_type<tc>, window_params = [{transform_indices = @transform_0, window_bounds = array<i64: 16, 1024>}, {transform_indices = @transform_1, window_bounds = array<i64: 16, 1024>}, {pipeline_mode = #tpu.pipeline_mode<synchronous>, transform_indices = @transform_2, window_bounds = array<i64: 1024, 128>}, {pipeline_mode = #tpu.pipeline_mode<synchronous>, transform_indices = @transform_3, window_bounds = array<i64: 1, 128>}, {pipeline_mode = #tpu.pipeline_mode<synchronous>, transform_indices = @transform_4, window_bounds = array<i64: 128, 128>}, {pipeline_mode = #tpu.pipeline_mode<synchronous>, transform_indices = @transform_5, window_bounds = array<i64: 128, 128>}, {pipeline_mode = #tpu.pipeline_mode<synchronous>, transform_indices = @transform_6, window_bounds = array<i64: 1, 128>}, {transform_indices = @transform_7, window_bounds = array<i64: 16, 128>}]} {
    %c0 = arith.constant 0 : index
    %c0_0 = arith.constant 0 : index
    %0 = vector.load %arg1[%c0, %c0_0] : memref<16x1024xbf16, #tpu.memory_space<vmem>>, vector<16x1024xbf16>
    %c0_1 = arith.constant 0 : index
    %c0_2 = arith.constant 0 : index
    %1 = vector.load %arg3[%c0_1, %c0_2] : memref<1024x128xbf16, #tpu.memory_space<vmem>>, vector<1024x128xbf16>
    %cst = arith.constant dense<0.000000e+00> : vector<16x128xf32>
    %2 = tpu.matmul %0, %1, %cst {dimension_numbers = #tpu.dot_dimension_numbers<[1], [0], [0], [1], [0, 0, 1, 1], [], []>} : vector<16x1024xbf16>, vector<1024x128xbf16>, vector<16x128xf32> -> vector<16x128xf32>
    %c0_3 = arith.constant 0 : index
    %c0_4 = arith.constant 0 : index
    %3 = vector.load %arg4[%c0_3, %c0_4] : memref<1x128xf32, #tpu.memory_space<vmem>>, vector<1x128xf32>
    %4 = vector.broadcast %3 : vector<1x128xf32> to vector<16x128xf32>
    %5 = arith.addf %2, %4 : vector<16x128xf32>
    %cst_5 = arith.constant 0.000000e+00 : f32
    %6 = vector.broadcast %cst_5 : f32 to vector<16x128xf32>
    %7 = arith.maximumf %5, %6 : vector<16x128xf32>
    %c0_6 = arith.constant 0 : index
    %c0_7 = arith.constant 0 : index
    %8 = vector.load %arg2[%c0_6, %c0_7] : memref<16x1024xbf16, #tpu.memory_space<vmem>>, vector<16x1024xbf16>
    %c0_8 = arith.constant 0 : index
    %c0_9 = arith.constant 0 : index
    %9 = vector.load %arg3[%c0_8, %c0_9] : memref<1024x128xbf16, #tpu.memory_space<vmem>>, vector<1024x128xbf16>
    %cst_10 = arith.constant dense<0.000000e+00> : vector<16x128xf32>
    %10 = tpu.matmul %8, %9, %cst_10 {dimension_numbers = #tpu.dot_dimension_numbers<[1], [0], [0], [1], [0, 0, 1, 1], [], []>} : vector<16x1024xbf16>, vector<1024x128xbf16>, vector<16x128xf32> -> vector<16x128xf32>
    %c0_11 = arith.constant 0 : index
    %c0_12 = arith.constant 0 : index
    %11 = vector.load %arg4[%c0_11, %c0_12] : memref<1x128xf32, #tpu.memory_space<vmem>>, vector<1x128xf32>
    %12 = vector.broadcast %11 : vector<1x128xf32> to vector<16x128xf32>
    %13 = arith.addf %10, %12 : vector<16x128xf32>
    %cst_13 = arith.constant 0.000000e+00 : f32
    %14 = vector.broadcast %cst_13 : f32 to vector<16x128xf32>
    %15 = arith.maximumf %13, %14 : vector<16x128xf32>
    %c0_14 = arith.constant 0 : index
    %c0_15 = arith.constant 0 : index
    %16 = vector.load %arg5[%c0_14, %c0_15] : memref<128x128xf32, #tpu.memory_space<vmem>>, vector<128x128xf32>
    %cst_16 = arith.constant dense<0.000000e+00> : vector<16x128xf32>
    %17 = tpu.matmul %7, %16, %cst_16 {dimension_numbers = #tpu.dot_dimension_numbers<[1], [0], [0], [1], [0, 0, 1, 1], [], []>} : vector<16x128xf32>, vector<128x128xf32>, vector<16x128xf32> -> vector<16x128xf32>
    %c0_17 = arith.constant 0 : index
    %c0_18 = arith.constant 0 : index
    %18 = vector.load %arg6[%c0_17, %c0_18] : memref<128x128xf32, #tpu.memory_space<vmem>>, vector<128x128xf32>
    %cst_19 = arith.constant dense<0.000000e+00> : vector<16x128xf32>
    %19 = tpu.matmul %15, %18, %cst_19 {dimension_numbers = #tpu.dot_dimension_numbers<[1], [0], [0], [1], [0, 0, 1, 1], [], []>} : vector<16x128xf32>, vector<128x128xf32>, vector<16x128xf32> -> vector<16x128xf32>
    %20 = arith.addf %17, %19 : vector<16x128xf32>
    %c0_20 = arith.constant 0 : index
    %c0_21 = arith.constant 0 : index
    %21 = vector.load %arg7[%c0_20, %c0_21] : memref<1x128xf32, #tpu.memory_space<vmem>>, vector<1x128xf32>
    %22 = vector.broadcast %21 : vector<1x128xf32> to vector<16x128xf32>
    %23 = arith.addf %20, %22 : vector<16x128xf32>
    %24 = arith.negf %23 : vector<16x128xf32>
    %25 = math.exp %24 : vector<16x128xf32>
    %cst_22 = arith.constant 1.000000e+00 : f32
    %26 = vector.broadcast %cst_22 : f32 to vector<16x128xf32>
    %27 = arith.addf %26, %25 : vector<16x128xf32>
    %28 = arith.divf %26, %27 : vector<16x128xf32>
    %c0_23 = arith.constant 0 : index
    %c0_24 = arith.constant 0 : index
    %29 = vector.load %arg8[%c0_23, %c0_24] : memref<16x128xf32, #tpu.memory_space<vmem>>, vector<16x128xf32>
    tpu.vector_store %arg8[%c0_23, %c0_24], %28 {strides = array<i32>} : memref<16x128xf32, #tpu.memory_space<vmem>>, vector<16x128xf32>,
    return
  }
  func.func @transform_0(%arg0: i32) -> (i32, i32) {
    %c0_i32 = arith.constant 0 : i32
    %c0_i32_0 = arith.constant 0 : i32
    return %arg0, %c0_i32 : i32, i32
  }
  func.func @transform_1(%arg0: i32) -> (i32, i32) {
    %c0_i32 = arith.constant 0 : i32
    %c0_i32_0 = arith.constant 0 : i32
    return %arg0, %c0_i32 : i32, i32
  }
  func.func @transform_2(%arg0: i32) -> (i32, i32) {
    %c0_i32 = arith.constant 0 : i32
    %c0_i32_0 = arith.constant 0 : i32
    %c0_i32_1 = arith.constant 0 : i32
    return %c0_i32, %c0_i32_0 : i32, i32
  }
  func.func @transform_3(%arg0: i32) -> (i32, i32) {
    %c0_i32 = arith.constant 0 : i32
    %c0_i32_0 = arith.constant 0 : i32
    %c0_i32_1 = arith.constant 0 : i32
    return %c0_i32, %c0_i32_0 : i32, i32
  }
  func.func @transform_4(%arg0: i32) -> (i32, i32) {
    %c0_i32 = arith.constant 0 : i32
    %c0_i32_0 = arith.constant 0 : i32
    %c0_i32_1 = arith.constant 0 : i32
    return %c0_i32, %c0_i32_0 : i32, i32
  }
  func.func @transform_5(%arg0: i32) -> (i32, i32) {
    %c0_i32 = arith.constant 0 : i32
    %c0_i32_0 = arith.constant 0 : i32
    %c0_i32_1 = arith.constant 0 : i32
    return %c0_i32, %c0_i32_0 : i32, i32
  }
  func.func @transform_6(%arg0: i32) -> (i32, i32) {
    %c0_i32 = arith.constant 0 : i32
    %c0_i32_0 = arith.constant 0 : i32
    %c0_i32_1 = arith.constant 0 : i32
    return %c0_i32, %c0_i32_0 : i32, i32
  }
  func.func @transform_7(%arg0: i32) -> (i32, i32) {
    %c0_i32 = arith.constant 0 : i32
    %c0_i32_0 = arith.constant 0 : i32
    return %arg0, %c0_i32 : i32, i32
  }
}

</mosaic_0001>

<bundles_post_ra>
// kernel: tpu_custom_call.1
= control target key start
LH: loop header
LB: loop body
LE: loop exit
PB: predicated region body
PF: predicated region fallthrough
CT: control target
= control target key end

     0   :  { %12 = vsyncpa [#allocation3], 0  ;;  %s2045_s0 = inlined_call_operand.hbm [shape: bf16[16,1024], index: 0, kind: input, shape index: {}]   ;;  %s2046_s1 = inlined_call_operand.hbm [shape: bf16[16,1024], index: 1, kind: input, shape index: {}]   ;;  %s2047_s2 = inlined_call_operand.hbm [shape: bf16[1024,128], index: 2, kind: input, shape index: {}]   ;;  %s2048_s3 = inlined_call_operand.vmem [shape: f32[1,128], index: 3, kind: input, shape index: {}]   ;;  %s2049_s4 = inlined_call_operand.hbm [shape: f32[128,128], index: 4, kind: input, shape index: {}]   ;;  %s2050_s5 = inlined_call_operand.hbm [shape: f32[128,128], index: 5, kind: input, shape index: {}]   ;;  %s2051_s6 = inlined_call_operand.vmem [shape: f32[1,128], index: 6, kind: input, shape index: {}]   ;;  %s2052_s7 = inlined_call_operand.hbm [shape: f32[16,128], index: 7, kind: output, shape index: {}]  }
   0x1   :  { %13 = vsyncpa [#allocation6], 0 }
   0x2   :  { %14 = vsyncpa [#allocation9], 0 }
   0x3   :  { %15 = vsyncpa [#allocation4], 0  ;;  %s33_s26 = sshll.u32 %s2046_s1, 4  ;;  %s1698_s27 = smov [#allocation5]   ;;  %s34_s26 = int_to_ptr.hbm [resolvable:$true] %s33_s26 }
   0x4   :  { %s35_s28 = sshll.u32 %s1698_s27, 4  ;;  %s61_s8 = sshll.u32 %s2049_s4, 4  ;;  %s36_s28 = int_to_ptr.vmem [resolvable:$true] %s35_s28  ;;  %s62_s8 = int_to_ptr.hbm [resolvable:$true] %s61_s8 }
   0x5   :  { %s1699_s9 = smov 512   ;;  %s1700_s10 = smov 32  }
   0x6   :  { %41 = dma.hbm_to_vmem [thread:$0]  %s34_s26, 1024, %s36_s28, [#allocation6], %s1699_s9, %s1699_s9, %s1700_s10  }
   0x7   :  { %s1701_s11 = smov [#allocation8]   ;;  %s1702_s13 = smov 128  }
   0x8   :  { %s63_s12 = sshll.u32 %s1701_s11, 4  ;;  %s1703_s14 = smov 8   ;;  %s64_s12 = int_to_ptr.vmem [resolvable:$true] %s63_s12 }
   0x9   :  { %69 = dma.hbm_to_vmem [thread:$0]  %s62_s8, 2048, %s64_s12, [#allocation9], %s1702_s13, %s1702_s13, %s1703_s14  }
   0xa   :  { %s20_s16 = sshll.u32 %s2045_s0, 4  ;;  %s1704_s17 = smov [#allocation2]   ;;  %s21_s16 = int_to_ptr.hbm [resolvable:$true] %s20_s16 }
   0xb   :  { %s22_s4 = sshll.u32 %s1704_s17, 4  ;;  %s46_s20 = sshll.u32 %s2047_s2, 4  ;;  %s23_s4 = int_to_ptr.vmem [resolvable:$true] %s22_s4  ;;  %s47_s20 = int_to_ptr.hbm [resolvable:$true] %s46_s20 }
   0xc   :  { %28 = dma.hbm_to_vmem [thread:$0]  %s21_s16, 1024, %s23_s4, [#allocation3], %s1699_s9, %s1699_s9, %s1700_s10  }
   0xd   :  { %s1705_s21 = smov [#allocation7]   ;;  %s1706_s23 = smov 64  }
   0xe   :  { %s48_s22 = sshll.u32 %s1705_s21, 4  ;;  %s1707_s24 = smov 4   ;;  %s49_s22 = int_to_ptr.vmem [resolvable:$true] %s48_s22 }
   0xf   :  { %54 = dma.hbm_to_vmem [thread:$0]  %s47_s20, 8192, %s49_s22, [#allocation6], %s1706_s23, %s1706_s23, %s1707_s24  }
  0x10   :  { %s74_s0 = sshll.u32 %s2050_s5, 4  ;;  %s1708_s27 = smov [#allocation10]   ;;  %s75_s0 = int_to_ptr.hbm [resolvable:$true] %s74_s0 }
  0x11   :  { %s76_s28 = sshll.u32 %s1708_s27, 4  ;;  %s77_s28 = int_to_ptr.vmem [resolvable:$true] %s76_s28 }
  0x12   :  { %82 = dma.hbm_to_vmem [thread:$0]  %s75_s0, 2048, %s77_s28, [#allocation9], %s1702_s13, %s1702_s13, %s1703_s14  }
  0x13   :  { %1690 = dma.done.wait [#allocation3], 1024  }
  0x14   :  { %1691 = vsyncadd [#allocation3], 4294966272 }
  0x15   :  { %1692 = dma.done.wait [#allocation6], 9216  }
  0x16   :  { %1693 = vsyncadd [#allocation6], 4294958080 }
  0x17   :  { %1694 = dma.done.wait [#allocation9], 4096  }
  0x18   :  { %1695 = vsyncadd [#allocation9], 4294963200  ;;  %v1771_v0 = vld [vmem:[#allocation7 + $0x38] sm:$0xff]  ;;  %v1781_v4 = vld [vmem:[#allocation7 + $0x30] sm:$0xff]  ;;  %s1075_s10 = sshll.u32 %s2052_s7, 4  ;;  %s1076_s10 = int_to_ptr.hbm [resolvable:$true] %s1075_s10 }
  0x19   :  { %v1773_v1 = vld [vmem:[#allocation7 + $0x78] sm:$0xff]  ;;  %669 = vmatpush.bf16.msra.mxu0 %v1771_v0  ;;  %v1783_v5 = vld [vmem:[#allocation7 + $0x70] sm:$0xff]  ;;  %v1793_v8 = vld [vmem:[#allocation7 + $0x28] sm:$0xff] }
  0x1a   :  { %v1775_v2 = vld [vmem:[#allocation7 + $0xb8] sm:$0xff]  ;;  %683 = vmatpush.bf16.msra.mxu1 %v1773_v1  ;;  %v1787_v6 = vld [vmem:[#allocation7 + $0xb0] sm:$0xff]  ;;  %v1795_v9 = vld [vmem:[#allocation7 + $0x68] sm:$0xff] }
  0x1b   :  { %v1777_v3 = vld [vmem:[#allocation7 + $0xf8] sm:$0xff]  ;;  %697 = vmatpush.bf16.msra.mxu2 %v1775_v2  ;;  %v1789_v7 = vld [vmem:[#allocation7 + $0xf0] sm:$0xff]  ;;  %v1799_v10 = vld [vmem:[#allocation7 + $0xa8] sm:$0xff] }
  0x1c   :  { %711 = vmatpush.bf16.msra.mxu3 %v1777_v3  ;;  %v1801_v11 = vld [vmem:[#allocation7 + $0xe8] sm:$0xff]  ;;  %v1805_v12 = vld [vmem:[#allocation7 + $0x20] sm:$0xff]  ;;  %v1817_v16 = vld [vmem:[#allocation7 + $0x18] sm:$0xff] }
  0x1d   :  { %670 = vmatpush.bf16.msra.mxu0 %v1781_v4  ;;  %v1807_v13 = vld [vmem:[#allocation7 + $0x60] sm:$0xff]  ;;  %v1819_v17 = vld [vmem:[#allocation7 + $0x58] sm:$0xff]  ;;  %v1829_v20 = vld [vmem:[#allocation7 + $0x10] sm:$0xff] }
  0x1e   :  { %684 = vmatpush.bf16.msra.mxu1 %v1783_v5  ;;  %v1811_v14 = vld [vmem:[#allocation7 + $0xa0] sm:$0xff]  ;;  %v1823_v18 = vld [vmem:[#allocation7 + $0x98] sm:$0xff]  ;;  %v1831_v21 = vld [vmem:[#allocation7 + $0x50] sm:$0xff] }
  0x1f   :  { %698 = vmatpush.bf16.msra.mxu2 %v1787_v6  ;;  %v1813_v15 = vld [vmem:[#allocation7 + $0xe0] sm:$0xff]  ;;  %v1825_v19 = vld [vmem:[#allocation7 + $0xd8] sm:$0xff]  ;;  %v1835_v22 = vld [vmem:[#allocation7 + $0x90] sm:$0xff] }
  0x20   :  { %712 = vmatpush.bf16.msra.mxu3 %v1789_v7  ;;  %v1837_v23 = vld [vmem:[#allocation7 + $0xd0] sm:$0xff]  ;;  %v1841_v24 = vld [vmem:[#allocation7 + $0x8] sm:$0xff]  ;;  %v1851_v28 = vld [vmem:[#allocation7] sm:$0xff] }
  0x21   :  { %671 = vmatpush.bf16.msra.mxu0 %v1793_v8  ;;  %v1843_v25 = vld [vmem:[#allocation7 + $0x48] sm:$0xff]  ;;  %v1853_v29 = vld [vmem:[#allocation7 + $0x40] sm:$0xff]  ;;  %v1861_v32 = vld [vmem:[#allocation7 + $0x138] sm:$0xff] }
  0x22   :  { %685 = vmatpush.bf16.msra.mxu1 %v1795_v9  ;;  %v1847_v26 = vld [vmem:[#allocation7 + $0x88] sm:$0xff]  ;;  %v1855_v30 = vld [vmem:[#allocation7 + $0x80] sm:$0xff]  ;;  %v1863_v33 = vld [vmem:[#allocation7 + $0x178] sm:$0xff] }
  0x23   :  { %699 = vmatpush.bf16.msra.mxu2 %v1799_v10  ;;  %v1849_v27 = vld [vmem:[#allocation7 + $0xc8] sm:$0xff]  ;;  %v1857_v31 = vld [vmem:[#allocation7 + $0xc0] sm:$0xff]  ;;  %v1867_v42 = vld [vmem:[#allocation7 + $0x1b8] sm:$0xff] }
  0x24   :  { %713 = vmatpush.bf16.msra.mxu3 %v1801_v11  ;;  %v1092_v34 = vld [vmem:[#allocation2] sm:$0xf]  ;;  %v1100_v36 = vld [vmem:[#allocation2 + $0x8] sm:$0xf]  ;;  %v1412_v38 = vld [vmem:[#allocation2 + $0x4] sm:$0xf] }
  0x25   :  { %672 = vmatpush.bf16.msra.mxu0 %v1805_v12  ;;  %v1416_v35 = vld [vmem:[#allocation2 + $0x1c] sm:$0xf0]  ;;  %v1417_v37 = vld [vmem:[#allocation2 + $0x24] sm:$0xf0]  ;;  %v1094_v39 = vld [vmem:[#allocation2 + $0x20] sm:$0xf0] }
  0x26   :  { %686 = vmatpush.bf16.msra.mxu1 %v1807_v13  ;;  %v1413_v40 = vld [vmem:[#allocation2 + $0xc] sm:$0xf]  ;;  %v1869_v43 = vld [vmem:[#allocation7 + $0x1f8] sm:$0xff]  ;;  %v1093_v44 = vor.u32 %v1416_v35, %v1092_v34  ;;  %v1101_v45 = vor.u32 %v1417_v37, %v1100_v36  ;;  %v1097_v46 = vor.u32 %v1412_v38, %v1094_v39  ;;  %v1877_v48 = vld [vmem:[#allocation7 + $0x130] sm:$0xff] }
  0x27   :  { %700 = vmatpush.bf16.msra.mxu2 %v1811_v14  ;;  %v1102_v41 = vld [vmem:[#allocation2 + $0x28] sm:$0xf0]  ;;  %v1879_v49 = vld [vmem:[#allocation7 + $0x170] sm:$0xff]  ;;  %v1901_v56 = vld [vmem:[#allocation7 + $0x120] sm:$0xff] }
  0x28   :  { %714 = vmatpush.bf16.msra.mxu3 %v1813_v15  ;;  %v1105_v47 = vor.u32 %v1413_v40, %v1102_v41  ;;  %v1883_v50 = vld [vmem:[#allocation7 + $0x1b0] sm:$0xff]  ;;  %v1889_v52 = vld [vmem:[#allocation7 + $0x128] sm:$0xff]  ;;  %v1903_v57 = vld [vmem:[#allocation7 + $0x160] sm:$0xff] }
  0x29   :  { %673 = vmatpush.bf16.msra.mxu0 %v1817_v16  ;;  %v1885_v51 = vld [vmem:[#allocation7 + $0x1f0] sm:$0xff]  ;;  %v1891_v53 = vld [vmem:[#allocation7 + $0x168] sm:$0xff]  ;;  %v1907_v58 = vld [vmem:[#allocation7 + $0x1a0] sm:$0xff] }
  0x2a   :  { %687 = vmatpush.bf16.msra.mxu1 %v1819_v17  ;;  %v1895_v54 = vld [vmem:[#allocation7 + $0x1a8] sm:$0xff]  ;;  %v1909_v59 = vld [vmem:[#allocation7 + $0x1e0] sm:$0xff]  ;;  %v1913_v60 = vld [vmem:[#allocation7 + $0x118] sm:$0xff] }
  0x2b   :  { %701 = vmatpush.bf16.msra.mxu2 %v1823_v18  ;;  %v1897_v55 = vld [vmem:[#allocation7 + $0x1e8] sm:$0xff]  ;;  %2065 = vst [vmem:[#allocation16_spill] sm:$0xff] %v1909_v59  ;;  %v1915_v61 = vld [vmem:[#allocation7 + $0x158] sm:$0xff]  ;;  %v1925_v34 = vld [vmem:[#allocation7 + $0x110] sm:$0xff] }
  0x2c   :  { %715 = vmatpush.bf16.msra.mxu3 %v1825_v19  ;;  %2066 = vst [vmem:[#allocation17_spill] sm:$0xff] %v1913_v60  ;;  %v1919_v62 = vld [vmem:[#allocation7 + $0x198] sm:$0xff]  ;;  %v1927_v35 = vld [vmem:[#allocation7 + $0x150] sm:$0xff]  ;;  %v1937_v38 = vld [vmem:[#allocation7 + $0x108] sm:$0xff] }
  0x2d   :  { %674 = vmatpush.bf16.msra.mxu0 %v1829_v20  ;;  %2067 = vst [vmem:[#allocation18_spill] sm:$0xff] %v1915_v61  ;;  %v1921_v63 = vld [vmem:[#allocation7 + $0x1d8] sm:$0xff]  ;;  %v1931_v36 = vld [vmem:[#allocation7 + $0x190] sm:$0xff]  ;;  %v1939_v39 = vld [vmem:[#allocation7 + $0x148] sm:$0xff] }
  0x2e   :  { %688 = vmatpush.bf16.msra.mxu1 %v1831_v21  ;;  %2068 = vst [vmem:[#allocation19_spill] sm:$0xff] %v1919_v62  ;;  %v1933_v37 = vld [vmem:[#allocation7 + $0x1d0] sm:$0xff]  ;;  %v1943_v40 = vld [vmem:[#allocation7 + $0x188] sm:$0xff] }
  0x2f   :  { %702 = vmatpush.bf16.msra.mxu2 %v1835_v22  ;;  %2069 = vst [vmem:[#allocation20_spill] sm:$0xff] %v1921_v63  ;;  %v1945_v41 = vld [vmem:[#allocation7 + $0x1c8] sm:$0xff] }
  0x30   :  { %716 = vmatpush.bf16.msra.mxu3 %v1837_v23  ;;  %2070 = vst [vmem:[#allocation21_spill] sm:$0xff] %v1925_v34 }
  0x31   :  { %675 = vmatpush.bf16.msra.mxu0 %v1841_v24  ;;  %2071 = vst [vmem:[#allocation22_spill] sm:$0xff] %v1927_v35 }
  0x32   :  { %689 = vmatpush.bf16.msra.mxu1 %v1843_v25  ;;  %2072 = vst [vmem:[#allocation23_spill] sm:$0xff] %v1931_v36 }
  0x33   :  { %703 = vmatpush.bf16.msra.mxu2 %v1847_v26  ;;  %2073 = vst [vmem:[#allocation24_spill] sm:$0xff] %v1933_v37 }
  0x34   :  { %717 = vmatpush.bf16.msra.mxu3 %v1849_v27  ;;  %2074 = vst [vmem:[#allocation25_spill] sm:$0xff] %v1937_v38 }
  0x35   :  { %676 = vmatpush.bf16.msra.mxu0 %v1851_v28  ;;  %2075 = vst [vmem:[#allocation26_spill] sm:$0xff] %v1939_v39 }
  0x36   :  { %690 = vmatpush.bf16.msra.mxu1 %v1853_v29  ;;  %2076 = vst [vmem:[#allocation27_spill] sm:$0xff] %v1943_v40 }
  0x37   :  { %704 = vmatpush.bf16.msra.mxu2 %v1855_v30 }
  0x38   :  { %718 = vmatpush.bf16.msra.mxu3 %v1857_v31  ;;  %677 = vmatmul.bf16.vlgmr.msra.gmra.mxu0 %v1093_v44  ;;  %v1947_v44 = vld [vmem:[#allocation7 + $0x100] sm:$0xff] }
  0x39   :  { %725 = vmatpush.bf16.msrb.mxu0 %v1861_v32  ;;  %691 = vmatmul.bf16.vlgmr.msra.gmra.mxu1 %v1097_v46  ;;  %v1951_v46 = vld [vmem:[#allocation7 + $0x180] sm:$0xff] }
  0x3a   :  { %739 = vmatpush.bf16.msrb.mxu1 %v1863_v33  ;;  %705 = vmatmul.bf16.vlgmr.msra.gmra.mxu2 %v1101_v45  ;;  %v1949_v45 = vld [vmem:[#allocation7 + $0x140] sm:$0xff] }
  0x3b   :  { %753 = vmatpush.bf16.msrb.mxu2 %v1867_v42  ;;  %719 = vmatmul.bf16.vlgmr.msra.gmra.mxu3 %v1105_v47  ;;  %v1955_v47 = vld [vmem:[#allocation7 + $0x1c0] sm:$0xff] }
  0x3c   :  { %767 = vmatpush.bf16.msrb.mxu3 %v1869_v43 }
  0x3d   :  { %726 = vmatpush.bf16.msrb.mxu0 %v1877_v48 }
  0x3e   :  { %740 = vmatpush.bf16.msrb.mxu1 %v1879_v49 }
  0x3f   :  { %754 = vmatpush.bf16.msrb.mxu2 %v1883_v50 }
  0x40   :  { %768 = vmatpush.bf16.msrb.mxu3 %v1885_v51 }
  0x41   :  { %727 = vmatpush.bf16.msrb.mxu0 %v1889_v52 }
  0x42   :  { %741 = vmatpush.bf16.msrb.mxu1 %v1891_v53 }
  0x43   :  { %755 = vmatpush.bf16.msrb.mxu2 %v1895_v54 }
  0x44   :  { %769 = vmatpush.bf16.msrb.mxu3 %v1897_v55 }
  0x45   :  { %728 = vmatpush.bf16.msrb.mxu0 %v1901_v56 }
  0x46   :  { %742 = vmatpush.bf16.msrb.mxu1 %v1903_v57 }
  0x47   :  { %756 = vmatpush.bf16.msrb.mxu2 %v1907_v58 }
  0x48   :  { %770 = vmatpush.bf16.msrb.mxu3 %v1909_v59 }
  0x49   :  { %729 = vmatpush.bf16.msrb.mxu0 %v1913_v60  ;;  %v1118_v60 = vld [vmem:[#allocation2 + $0x38] sm:$0xf0] }
  0x4a   :  { %743 = vmatpush.bf16.msrb.mxu1 %v1915_v61  ;;  %v1415_v61 = vld [vmem:[#allocation2 + $0x1c] sm:$0xf] }
  0x4b   :  { %757 = vmatpush.bf16.msrb.mxu2 %v1919_v62  ;;  %v1110_v62 = vld [vmem:[#allocation2 + $0x30] sm:$0xf0] }
  0x4c   :  { %771 = vmatpush.bf16.msrb.mxu3 %v1921_v63  ;;  %v1414_v63 = vld [vmem:[#allocation2 + $0x14] sm:$0xf] }
  0x4d   :  { %730 = vmatpush.bf16.msrb.mxu0 %v1925_v34  ;;  %v1419_v34 = vld [vmem:[#allocation2 + $0x34] sm:$0xf0]  ;;  %v1113_v59 = vor.u32 %v1414_v63, %v1110_v62  ;;  %v2030_v62 = vld [vmem:[%s2048_s3] ss:$0 sm:$0xff] }
  0x4e   :  { %744 = vmatpush.bf16.msrb.mxu1 %v1927_v35  ;;  %v1108_v35 = vld [vmem:[#allocation2 + $0x10] sm:$0xf] }
  0x4f   :  { %758 = vmatpush.bf16.msrb.mxu2 %v1931_v36  ;;  %v1418_v36 = vld [vmem:[#allocation2 + $0x2c] sm:$0xf0] }
  0x50   :  { %772 = vmatpush.bf16.msrb.mxu3 %v1933_v37  ;;  %v1116_v37 = vld [vmem:[#allocation2 + $0x18] sm:$0xf] }
  0x51   :  { %731 = vmatpush.bf16.msrb.mxu0 %v1937_v38  ;;  %v1109_v38 = vor.u32 %v1418_v36, %v1108_v35  ;;  %v946_v36 = vld [vmem:[#allocation8 + $0x8] sm:$0xff] }
  0x52   :  { %745 = vmatpush.bf16.msrb.mxu1 %v1939_v39  ;;  %v1117_v39 = vor.u32 %v1419_v34, %v1116_v37  ;;  %v947_v34 = vld [vmem:[#allocation8 + $0x10] sm:$0xff] }
  0x53   :  { %759 = vmatpush.bf16.msrb.mxu2 %v1943_v40  ;;  %v1121_v40 = vor.u32 %v1415_v61, %v1118_v60  ;;  %v948_v60 = vld [vmem:[#allocation8 + $0x18] sm:$0xff] }
  0x54   :  { %773 = vmatpush.bf16.msrb.mxu3 %v1945_v41 }
  0x55   :  { %732 = vmatpush.bf16.msrb.mxu0 %v1947_v44 }
  0x56   :  { %746 = vmatpush.bf16.msrb.mxu1 %v1949_v45 }
  0x57   :  { %760 = vmatpush.bf16.msrb.mxu2 %v1951_v46 }
  0x58   :  { %774 = vmatpush.bf16.msrb.mxu3 %v1955_v47  ;;  %733 = vmatmul.bf16.vlgmr.msrb.gmra.mxu0 %v1109_v38 }
  0x59   :  { %831 = vmatpush.bf16.msra.mxu0 %v1771_v0  ;;  %747 = vmatmul.bf16.vlgmr.msrb.gmra.mxu1 %v1113_v59  ;;  %v1388_v0 = vld [vmem:[#allocation5 + $0x8] sm:$0xf]  ;;  %v949_v59 = vld [vmem:[#allocation8 + $0x20] sm:$0xff] }
  0x5a   :  { %845 = vmatpush.bf16.msra.mxu1 %v1773_v1  ;;  %761 = vmatmul.bf16.vlgmr.msrb.gmra.mxu2 %v1117_v39  ;;  %v1489_v1 = vld [vmem:[#allocation5 + $0x24] sm:$0xf0]  ;;  %v945_v39 = vld [vmem:[#allocation8] sm:$0xff] }
  0x5b   :  { %859 = vmatpush.bf16.msra.mxu2 %v1775_v2  ;;  %775 = vmatmul.bf16.vlgmr.msrb.gmra.mxu3 %v1121_v40  ;;  %v1380_v2 = vld [vmem:[#allocation5] sm:$0xf] }
  0x5c   :  { %873 = vmatpush.bf16.msra.mxu3 %v1777_v3  ;;  %v1488_v3 = vld [vmem:[#allocation5 + $0x1c] sm:$0xf0] }
  0x5d   :  { %832 = vmatpush.bf16.msra.mxu0 %v1781_v4  ;;  %v1485_v4 = vld [vmem:[#allocation5 + $0xc] sm:$0xf] }
  0x5e   :  { %846 = vmatpush.bf16.msra.mxu1 %v1783_v5  ;;  %v1390_v5 = vld [vmem:[#allocation5 + $0x28] sm:$0xf0] }
  0x5f   :  { %860 = vmatpush.bf16.msra.mxu2 %v1787_v6  ;;  %v1484_v6 = vld [vmem:[#allocation5 + $0x4] sm:$0xf] }
  0x60   :  { %874 = vmatpush.bf16.msra.mxu3 %v1789_v7  ;;  %v1382_v7 = vld [vmem:[#allocation5 + $0x20] sm:$0xf0] }
  0x61   :  { %833 = vmatpush.bf16.msra.mxu0 %v1793_v8  ;;  %v1389_v8 = vor.u32 %v1489_v1, %v1388_v0 }
  0x62   :  { %847 = vmatpush.bf16.msra.mxu1 %v1795_v9  ;;  %v1381_v9 = vor.u32 %v1488_v3, %v1380_v2 }
  0x63   :  { %861 = vmatpush.bf16.msra.mxu2 %v1799_v10  ;;  %v1393_v10 = vor.u32 %v1485_v4, %v1390_v5 }
  0x64   :  { %875 = vmatpush.bf16.msra.mxu3 %v1801_v11  ;;  %v1385_v11 = vor.u32 %v1484_v6, %v1382_v7 }
  0x65   :  { %834 = vmatpush.bf16.msra.mxu0 %v1805_v12  ;;  %v2077_v12 = vld [vmem:[#allocation16_spill] sm:$0xff] }
  0x66   :  { %848 = vmatpush.bf16.msra.mxu1 %v1807_v13  ;;  %v2078_v13 = vld [vmem:[#allocation17_spill] sm:$0xff] }
  0x67   :  { %862 = vmatpush.bf16.msra.mxu2 %v1811_v14  ;;  %v2079_v14 = vld [vmem:[#allocation18_spill] sm:$0xff] }
  0x68   :  { %876 = vmatpush.bf16.msra.mxu3 %v1813_v15  ;;  %v2080_v15 = vld [vmem:[#allocation19_spill] sm:$0xff] }
  0x69   :  { %835 = vmatpush.bf16.msra.mxu0 %v1817_v16  ;;  %v2081_v16 = vld [vmem:[#allocation20_spill] sm:$0xff] }
  0x6a   :  { %849 = vmatpush.bf16.msra.mxu1 %v1819_v17  ;;  %v2082_v17 = vld [vmem:[#allocation21_spill] sm:$0xff] }
  0x6b   :  { %863 = vmatpush.bf16.msra.mxu2 %v1823_v18  ;;  %v2083_v18 = vld [vmem:[#allocation22_spill] sm:$0xff] }
  0x6c   :  { %877 = vmatpush.bf16.msra.mxu3 %v1825_v19  ;;  %v2084_v19 = vld [vmem:[#allocation23_spill] sm:$0xff] }
  0x6d   :  { %836 = vmatpush.bf16.msra.mxu0 %v1829_v20  ;;  %v2085_v20 = vld [vmem:[#allocation24_spill] sm:$0xff] }
  0x6e   :  { %850 = vmatpush.bf16.msra.mxu1 %v1831_v21  ;;  %v1396_v21 = vld [vmem:[#allocation5 + $0x10] sm:$0xf] }
  0x6f   :  { %864 = vmatpush.bf16.msra.mxu2 %v1835_v22  ;;  %v1490_v22 = vld [vmem:[#allocation5 + $0x2c] sm:$0xf0] }
  0x70   :  { %878 = vmatpush.bf16.msra.mxu3 %v1837_v23  ;;  %v2086_v23 = vld [vmem:[#allocation25_spill] sm:$0xff] }
  0x71   :  { %837 = vmatpush.bf16.msra.mxu0 %v1841_v24  ;;  %v2087_v24 = vld [vmem:[#allocation26_spill] sm:$0xff] }
  0x72   :  { %851 = vmatpush.bf16.msra.mxu1 %v1843_v25  ;;  %v1486_v25 = vld [vmem:[#allocation5 + $0x14] sm:$0xf] }
  0x73   :  { %865 = vmatpush.bf16.msra.mxu2 %v1847_v26  ;;  %v1398_v26 = vld [vmem:[#allocation5 + $0x30] sm:$0xf0] }
  0x74   :  { %879 = vmatpush.bf16.msra.mxu3 %v1849_v27  ;;  %v1404_v27 = vld [vmem:[#allocation5 + $0x18] sm:$0xf] }
  0x75   :  { %838 = vmatpush.bf16.msra.mxu0 %v1851_v28  ;;  %v2088_v28 = vld [vmem:[#allocation27_spill] sm:$0xff] }
  0x76   :  { %852 = vmatpush.bf16.msra.mxu1 %v1853_v29  ;;  %v1491_v29 = vld [vmem:[#allocation5 + $0x34] sm:$0xf0] }
  0x77   :  { %866 = vmatpush.bf16.msra.mxu2 %v1855_v30  ;;  %v1487_v30 = vld [vmem:[#allocation5 + $0x1c] sm:$0xf] }
  0x78   :  { %880 = vmatpush.bf16.msra.mxu3 %v1857_v31  ;;  %839 = vmatmul.bf16.vlgmr.msra.gmra.mxu0 %v1381_v9  ;;  %v1406_v31 = vld [vmem:[#allocation5 + $0x38] sm:$0xf0] }
  0x79   :  { %887 = vmatpush.bf16.msrb.mxu0 %v1861_v32  ;;  %853 = vmatmul.bf16.vlgmr.msra.gmra.mxu1 %v1385_v11  ;;  %v1397_v32 = vor.u32 %v1490_v22, %v1396_v21  ;;  %v976_v9 = vld [vmem:[#allocation10 + $0x78] sm:$0xff] }
  0x7a   :  { %901 = vmatpush.bf16.msrb.mxu1 %v1863_v33  ;;  %867 = vmatmul.bf16.vlgmr.msra.gmra.mxu2 %v1389_v8  ;;  %v1401_v33 = vor.u32 %v1486_v25, %v1398_v26  ;;  %v972_v22 = vld [vmem:[#allocation10 + $0x58] sm:$0xff]  ;;  %v971_v26 = vld [vmem:[#allocation10 + $0x50] sm:$0xff] }
  0x7b   :  { %915 = vmatpush.bf16.msrb.mxu2 %v1867_v42  ;;  %881 = vmatmul.bf16.vlgmr.msra.gmra.mxu3 %v1393_v10  ;;  %v1405_v42 = vor.u32 %v1491_v29, %v1404_v27  ;;  %v970_v27 = vld [vmem:[#allocation10 + $0x48] sm:$0xff]  ;;  %v969_v29 = vld [vmem:[#allocation10 + $0x40] sm:$0xff] }
  0x7c   :  { %929 = vmatpush.bf16.msrb.mxu3 %v1869_v43  ;;  %v1409_v43 = vor.u32 %v1487_v30, %v1406_v31  ;;  %v968_v31 = vld [vmem:[#allocation10 + $0x38] sm:$0xff] }
  0x7d   :  { %888 = vmatpush.bf16.msrb.mxu0 %v1877_v48  ;;  %v960_v48 = vld [vmem:[#allocation8 + $0x78] sm:$0xff] }
  0x7e   :  { %902 = vmatpush.bf16.msrb.mxu1 %v1879_v49  ;;  %v959_v49 = vld [vmem:[#allocation8 + $0x70] sm:$0xff] }
  0x7f   :  { %916 = vmatpush.bf16.msrb.mxu2 %v1883_v50  ;;  %v958_v50 = vld [vmem:[#allocation8 + $0x68] sm:$0xff] }
  0x80   :  { %930 = vmatpush.bf16.msrb.mxu3 %v1885_v51  ;;  %v957_v51 = vld [vmem:[#allocation8 + $0x60] sm:$0xff] }
  0x81   :  { %889 = vmatpush.bf16.msrb.mxu0 %v1889_v52  ;;  %v956_v52 = vld [vmem:[#allocation8 + $0x58] sm:$0xff] }
  0x82   :  { %903 = vmatpush.bf16.msrb.mxu1 %v1891_v53  ;;  %v955_v53 = vld [vmem:[#allocation8 + $0x50] sm:$0xff] }
  0x83   :  { %917 = vmatpush.bf16.msrb.mxu2 %v1895_v54  ;;  %v954_v54 = vld [vmem:[#allocation8 + $0x48] sm:$0xff] }
  0x84   :  { %931 = vmatpush.bf16.msrb.mxu3 %v1897_v55  ;;  %v953_v55 = vld [vmem:[#allocation8 + $0x40] sm:$0xff] }
  0x85   :  { %890 = vmatpush.bf16.msrb.mxu0 %v1901_v56  ;;  %v952_v56 = vld [vmem:[#allocation8 + $0x38] sm:$0xff] }
  0x86   :  { %904 = vmatpush.bf16.msrb.mxu1 %v1903_v57  ;;  %v951_v57 = vld [vmem:[#allocation8 + $0x30] sm:$0xff] }
  0x87   :  { %918 = vmatpush.bf16.msrb.mxu2 %v1907_v58  ;;  %v950_v58 = vld [vmem:[#allocation8 + $0x28] sm:$0xff] }
  0x88   :  { %932 = vmatpush.bf16.msrb.mxu3 %v2077_v12 }
  0x89   :  { %891 = vmatpush.bf16.msrb.mxu0 %v2078_v13  ;;  %v975_v13 = vld [vmem:[#allocation10 + $0x70] sm:$0xff] }
  0x8a   :  { %905 = vmatpush.bf16.msrb.mxu1 %v2079_v14  ;;  %v974_v14 = vld [vmem:[#allocation10 + $0x68] sm:$0xff] }
  0x8b   :  { %919 = vmatpush.bf16.msrb.mxu2 %v2080_v15 }
  0x8c   :  { %933 = vmatpush.bf16.msrb.mxu3 %v2081_v16 }
  0x8d   :  { %892 = vmatpush.bf16.msrb.mxu0 %v2082_v17 }
  0x8e   :  { %906 = vmatpush.bf16.msrb.mxu1 %v2083_v18  ;;  %v973_v18 = vld [vmem:[#allocation10 + $0x60] sm:$0xff] }
  0x8f   :  { %920 = vmatpush.bf16.msrb.mxu2 %v2084_v19 }
  0x90   :  { %934 = vmatpush.bf16.msrb.mxu3 %v2085_v20 }
  0x91   :  { %893 = vmatpush.bf16.msrb.mxu0 %v2086_v23 }
  0x92   :  { %907 = vmatpush.bf16.msrb.mxu1 %v2087_v24 }
  0x93   :  { %921 = vmatpush.bf16.msrb.mxu2 %v2088_v28 }
  0x94   :  { %935 = vmatpush.bf16.msrb.mxu3 %v1945_v41 }
  0x95   :  { %894 = vmatpush.bf16.msrb.mxu0 %v1947_v44 }
  0x96   :  { %908 = vmatpush.bf16.msrb.mxu1 %v1949_v45 }
  0x97   :  { %922 = vmatpush.bf16.msrb.mxu2 %v1951_v46 }
  0x98   :  { %936 = vmatpush.bf16.msrb.mxu3 %v1955_v47  ;;  %895 = vmatmul.bf16.vlgmr.msrb.gmra.mxu0 %v1397_v32  ;;  %v967_v32 = vld [vmem:[#allocation10 + $0x30] sm:$0xff] }
  0x99   :  { %909 = vmatmul.bf16.vlgmr.msrb.gmra.mxu1 %v1401_v33  ;;  %977 = vmatpush.msra.mxu0 %v976_v9  ;;  %v966_v33 = vld [vmem:[#allocation10 + $0x28] sm:$0xff] }
  0x9a   :  { %923 = vmatmul.bf16.vlgmr.msrb.gmra.mxu2 %v1405_v42  ;;  %1000 = vmatpush.msra.mxu1 %v960_v48  ;;  %v965_v42 = vld [vmem:[#allocation10 + $0x20] sm:$0xff] }
  0x9b   :  { %937 = vmatmul.bf16.vlgmr.msrb.gmra.mxu3 %v1409_v43  ;;  %1492 = vmatpush.msra.mxu2 %v976_v9  ;;  %v964_v43 = vld [vmem:[#allocation10 + $0x18] sm:$0xff]  ;;  %v1537_v9 = vld [vmem:[%s2051_s6] ss:$0 sm:$0xff]  ;;  %s1709_s6 = smov [#allocation11]  }
  0x9c   :  { %1508 = vmatpush.msra.mxu3 %v960_v48  ;;  %1001 = vmatpush.msra.mxu1 %v959_v49  ;;  %v963_v48 = vld [vmem:[#allocation10 + $0x10] sm:$0xff]  ;;  %s1073_s30 = sshll.u32 %s1709_s6, 4  ;;  %s1074_s30 = int_to_ptr.vmem [resolvable:$true] %s1073_s30 }
  0x9d   :  { %978 = vmatpush.msra.mxu0 %v975_v13  ;;  %1493 = vmatpush.msra.mxu2 %v975_v13 }
  0x9e   :  { %1509 = vmatpush.msra.mxu3 %v959_v49  ;;  %1002 = vmatpush.msra.mxu1 %v958_v50  ;;  %v962_v49 = vld [vmem:[#allocation10 + $0x8] sm:$0xff] }
  0x9f   :  { %979 = vmatpush.msra.mxu0 %v974_v14  ;;  %1494 = vmatpush.msra.mxu2 %v974_v14 }
  0xa0   :  { %1510 = vmatpush.msra.mxu3 %v958_v50  ;;  %1003 = vmatpush.msra.mxu1 %v957_v51  ;;  %v961_v50 = vld [vmem:[#allocation10] sm:$0xff] }
  0xa1   :  { %980 = vmatpush.msra.mxu0 %v973_v18  ;;  %1495 = vmatpush.msra.mxu2 %v973_v18 }
  0xa2   :  { %1511 = vmatpush.msra.mxu3 %v957_v51  ;;  %1004 = vmatpush.msra.mxu1 %v956_v52 }
  0xa3   :  { %981 = vmatpush.msra.mxu0 %v972_v22  ;;  %1496 = vmatpush.msra.mxu2 %v972_v22 }
  0xa4   :  { %1512 = vmatpush.msra.mxu3 %v956_v52  ;;  %1005 = vmatpush.msra.mxu1 %v955_v53 }
  0xa5   :  { %982 = vmatpush.msra.mxu0 %v971_v26  ;;  %1497 = vmatpush.msra.mxu2 %v971_v26 }
  0xa6   :  { %1513 = vmatpush.msra.mxu3 %v955_v53  ;;  %1006 = vmatpush.msra.mxu1 %v954_v54 }
  0xa7   :  { %983 = vmatpush.msra.mxu0 %v970_v27  ;;  %1498 = vmatpush.msra.mxu2 %v970_v27 }
  0xa8   :  { %1514 = vmatpush.msra.mxu3 %v954_v54  ;;  %1007 = vmatpush.msra.mxu1 %v953_v55 }
  0xa9   :  { %984 = vmatpush.msra.mxu0 %v969_v29  ;;  %1499 = vmatpush.msra.mxu2 %v969_v29 }
  0xaa   :  { %1515 = vmatpush.msra.mxu3 %v953_v55  ;;  %1008 = vmatpush.msra.mxu1 %v952_v56 }
  0xab   :  { %985 = vmatpush.msra.mxu0 %v968_v31  ;;  %1500 = vmatpush.msra.mxu2 %v968_v31 }
  0xac   :  { %1516 = vmatpush.msra.mxu3 %v952_v56  ;;  %1009 = vmatpush.msra.mxu1 %v951_v57 }
  0xad   :  { %986 = vmatpush.msra.mxu0 %v967_v32  ;;  %1501 = vmatpush.msra.mxu2 %v967_v32 }
  0xae   :  { %1517 = vmatpush.msra.mxu3 %v951_v57  ;;  %1010 = vmatpush.msra.mxu1 %v950_v58 }
  0xaf   :  { %987 = vmatpush.msra.mxu0 %v966_v33  ;;  %1502 = vmatpush.msra.mxu2 %v966_v33 }
  0xb0   :  { %1518 = vmatpush.msra.mxu3 %v950_v58  ;;  %1011 = vmatpush.msra.mxu1 %v949_v59 }
  0xb1   :  { %988 = vmatpush.msra.mxu0 %v965_v42  ;;  %1503 = vmatpush.msra.mxu2 %v965_v42 }
  0xb2   :  { %1519 = vmatpush.msra.mxu3 %v949_v59  ;;  %1012 = vmatpush.msra.mxu1 %v948_v60 }
  0xb3   :  { %989 = vmatpush.msra.mxu0 %v964_v43  ;;  %1504 = vmatpush.msra.mxu2 %v964_v43 }
  0xb4   :  { %1520 = vmatpush.msra.mxu3 %v948_v60  ;;  %1013 = vmatpush.msra.mxu1 %v947_v34 }
  0xb5   :  { %v678_v61 = vpop.f32.mrf.mxu0  ;;  %990 = vmatpush.msra.mxu0 %v963_v48  ;;  %1505 = vmatpush.msra.mxu2 %v963_v48 }
  0xb6   :  { %v692_v63 = vpop.f32.mrf.mxu1  ;;  %1521 = vmatpush.msra.mxu3 %v947_v34  ;;  %v679_v35 = vadd.f32 %v2030_v62, %v678_v61  ;;  %1014 = vmatpush.msra.mxu1 %v946_v36 }
  0xb7   :  { %991 = vmatpush.msra.mxu0 %v962_v49  ;;  %1506 = vmatpush.msra.mxu2 %v962_v49 }
  0xb8   :  { %1522 = vmatpush.msra.mxu3 %v946_v36  ;;  %1015 = vmatpush.msra.mxu1 %v945_v39  ;;  %v693_v40 = vadd.f32 %v692_v63, %v679_v35 }
  0xb9   :  { %992 = vmatpush.msra.mxu0 %v961_v50  ;;  %1507 = vmatpush.msra.mxu2 %v961_v50 }
  0xba   :  { %1523 = vmatpush.msra.mxu3 %v945_v39 }
  0xbd   :  { %v706_v37 = vpop.f32.mrf.mxu2  ;;  %v680_v41 = vpop.f32.mrf.mxu0 }
  0xbe   :  { %v720_v38 = vpop.f32.mrf.mxu3  ;;  %v694_v44 = vpop.f32.mrf.mxu1  ;;  %v707_v45 = vadd.f32 %v706_v37, %v693_v40  ;;  %v681_v46 = vadd.f32 %v2030_v62, %v680_v41 }
  0xc0   :  { %v721_v0 = vadd.f32 %v720_v38, %v707_v45  ;;  %v695_v1 = vadd.f32 %v694_v44, %v681_v46 }
  0xc5   :  { %v708_v47 = vpop.f32.mrf.mxu2 }
  0xc6   :  { %v722_v2 = vpop.f32.mrf.mxu3  ;;  %v709_v4 = vadd.f32 %v708_v47, %v695_v1 }
  0xc8   :  { %v723_v8 = vadd.f32 %v722_v2, %v709_v4 }
  0xd5   :  { %v734_v3 = vpop.f32.mrf.mxu0 }
  0xd6   :  { %v735_v5 = vadd.f32 %v734_v3, %v721_v0  ;;  %v748_v6 = vpop.f32.mrf.mxu1 }
  0xd8   :  { %v749_v7 = vadd.f32 %v748_v6, %v735_v5 }
  0xdd   :  { %v762_v10 = vpop.f32.mrf.mxu2  ;;  %v736_v15 = vpop.f32.mrf.mxu0 }
  0xde   :  { %v763_v11 = vadd.f32 %v762_v10, %v749_v7  ;;  %v776_v12 = vpop.f32.mrf.mxu3  ;;  %v737_v16 = vadd.f32 %v736_v15, %v723_v8  ;;  %v750_v19 = vpop.f32.mrf.mxu1 }
  0xe0   :  { %v777_v17 = vadd.f32 %v776_v12, %v763_v11  ;;  %v751_v21 = vadd.f32 %v750_v19, %v737_v16 }
  0xe2   :  { %v781_v20 = vmax.f32 %v777_v17, 0.0 }
  0xe4   :  { %1016 = vmatmul.f32.vlgmr.msra.gmra.mxu1 %v781_v20 }
  0xe5   :  { %v764_v23 = vpop.f32.mrf.mxu2 }
  0xe6   :  { %v765_v24 = vadd.f32 %v764_v23, %v751_v21  ;;  %v778_v25 = vpop.f32.mrf.mxu3 }
  0xe8   :  { %v779_v28 = vadd.f32 %v778_v25, %v765_v24 }
  0xea   :  { %v782_v30 = vmax.f32 %v779_v28, 0.0 }
  0xec   :  { %1019 = vmatmul.f32.vlgmr.msra.gmra.mxu3 %v782_v30 }
  0xf5   :  { %v840_v51 = vpop.f32.mrf.mxu0 }
  0xf6   :  { %v854_v52 = vpop.f32.mrf.mxu1  ;;  %v841_v53 = vadd.f32 %v2030_v62, %v840_v51 }
  0xf8   :  { %v855_v56 = vadd.f32 %v854_v52, %v841_v53 }
  0xfd   :  { %v868_v54 = vpop.f32.mrf.mxu2  ;;  %v842_v57 = vpop.f32.mrf.mxu0 }
  0xfe   :  { %v882_v55 = vpop.f32.mrf.mxu3  ;;  %v856_v58 = vpop.f32.mrf.mxu1  ;;  %v869_v59 = vadd.f32 %v868_v54, %v855_v56  ;;  %v843_v60 = vadd.f32 %v2030_v62, %v842_v57 }
 0x100   :  { %v883_v34 = vadd.f32 %v882_v55, %v869_v59  ;;  %v857_v35 = vadd.f32 %v856_v58, %v843_v60 }
 0x105   :  { %v870_v61 = vpop.f32.mrf.mxu2 }
 0x106   :  { %v884_v63 = vpop.f32.mrf.mxu3  ;;  %v871_v39 = vadd.f32 %v870_v61, %v857_v35 }
 0x108   :  { %v885_v45 = vadd.f32 %v884_v63, %v871_v39 }
 0x115   :  { %v896_v36 = vpop.f32.mrf.mxu0 }
 0x116   :  { %v897_v37 = vadd.f32 %v896_v36, %v883_v34  ;;  %v910_v38 = vpop.f32.mrf.mxu1 }
 0x118   :  { %v911_v40 = vadd.f32 %v910_v38, %v897_v37 }
 0x11d   :  { %v924_v41 = vpop.f32.mrf.mxu2  ;;  %v898_v47 = vpop.f32.mrf.mxu0 }
 0x11e   :  { %v938_v44 = vpop.f32.mrf.mxu3  ;;  %v925_v46 = vadd.f32 %v924_v41, %v911_v40  ;;  %v899_v1 = vadd.f32 %v898_v47, %v885_v45  ;;  %v912_v3 = vpop.f32.mrf.mxu1 }
 0x120   :  { %v939_v0 = vadd.f32 %v938_v44, %v925_v46  ;;  %v913_v4 = vadd.f32 %v912_v3, %v899_v1 }
 0x122   :  { %v943_v2 = vmax.f32 %v939_v0, 0.0 }
 0x124   :  { %993 = vmatmul.f32.vlgmr.msra.gmra.mxu0 %v943_v2 }
 0x125   :  { %v926_v62 = vpop.f32.mrf.mxu2 }
 0x126   :  { %v927_v5 = vadd.f32 %v926_v62, %v913_v4  ;;  %v940_v6 = vpop.f32.mrf.mxu3 }
 0x128   :  { %v941_v7 = vadd.f32 %v940_v6, %v927_v5 }
 0x12a   :  { %v944_v8 = vmax.f32 %v941_v7, 0.0 }
 0x12c   :  { %996 = vmatmul.f32.vlgmr.msra.gmra.mxu2 %v944_v8 }
 0x161   :  { %v1017_v10 = vpop.f32.mrf.mxu1 }
 0x16f   :  { %v1020_v16 = vpop.f32.mrf.mxu3 }
 0x1a1   :  { %v994_v11 = vpop.f32.mrf.mxu0 }
 0x1a2   :  { %v1018_v12 = vadd.f32 %v1017_v10, %v994_v11 }
 0x1a4   :  { %v1027_v13 = vadd.f32 %v1537_v9, %v1018_v12 }
 0x1a6   :  { %v1410_v14 = vmul.f32 -1.442695, %v1027_v13 }
 0x1a8   :  { %1538 = vpow2.f32 %v1410_v14 }
 0x1ae   :  { %v1539_v15 = vpop.eup %1538 }
 0x1af   :  { %v1035_v17 = vadd.f32 1.0, %v1539_v15  ;;  %v997_v18 = vpop.f32.mrf.mxu2 }
 0x1b0   :  { %v1021_v19 = vadd.f32 %v1020_v16, %v997_v18 }
 0x1b1   :  { %1540 = vrcp.f32 %v1035_v17  ;;  %v1048_v25 = vand.u32 2147483648, %v1035_v17  ;;  %v1046_v28 = vand.u32 2147483647, %v1035_v17  ;;  %vm1042_vm1 = vweird.f32 %v1035_v17 }
 0x1b2   :  { %v1028_v20 = vadd.f32 %v1537_v9, %v1021_v19 }
 0x1b3   :  { %v1049_v31 = vor.u32 1.1754944e-38, %v1048_v25  ;;  %vm1047_vm3 = vcmp.eq.f32.partialorder %v1046_v28, 8.507059e+37 }
 0x1b4   :  { %v1411_v21 = vmul.f32 -1.442695, %v1028_v20 }
 0x1b6   :  { %1542 = vpow2.f32 %v1411_v21 }
 0x1b7   :  { %v1541_v22 = vpop.eup %1540 }
 0x1b8   :  { %v1038_v23 = vmul.f32 %v1541_v22, %v1035_v17  ;;  %vm1043_vm0 = vweird.f32 %v1541_v22 }
 0x1b9   :  { %vm1044_vm2 = vmor %vm1042_vm1, %vm1043_vm0 }
 0x1ba   :  { %v1039_v24 = vsub.f32 1.0, %v1038_v23 }
 0x1bc   :  { %v1543_v26 = vpop.eup %1542  ;;  %v1040_v27 = vmul.f32 %v1541_v22, %v1039_v24 }
 0x1bd   :  { %v1036_v29 = vadd.f32 1.0, %v1543_v26 }
 0x1be   :  { %v1041_v30 = vadd.f32 %v1541_v22, %v1040_v27 }
 0x1bf   :  { %1544 = vrcp.f32 %v1036_v29  ;;  %v1063_v49 = vand.u32 2147483648, %v1036_v29  ;;  %v1061_v51 = vand.u32 2147483647, %v1036_v29  ;;  %vm1057_vm5 = vweird.f32 %v1036_v29 }
 0x1c0   :  { %v1045_v32 = vsel %vm1044_vm2, %v1541_v22, %v1041_v30 }
 0x1c1   :  { %v1050_v33 = vsel %vm1047_vm3, %v1049_v31, %v1045_v32  ;;  %v1064_v53 = vor.u32 1.1754944e-38, %v1063_v49  ;;  %vm1062_vm7 = vcmp.eq.f32.partialorder %v1061_v51, 8.507059e+37 }
 0x1c2   :  { %1067 = vst [vmem:[#allocation11] sm:$0xff] %v1050_v33 }
 0x1c5   :  { %v1545_v42 = vpop.eup %1544 }
 0x1c6   :  { %v1053_v43 = vmul.f32 %v1545_v42, %v1036_v29  ;;  %vm1058_vm4 = vweird.f32 %v1545_v42 }
 0x1c7   :  { %vm1059_vm6 = vmor %vm1057_vm5, %vm1058_vm4 }
 0x1c8   :  { %v1054_v48 = vsub.f32 1.0, %v1053_v43 }
 0x1ca   :  { %v1055_v50 = vmul.f32 %v1545_v42, %v1054_v48 }
 0x1cc   :  { %v1056_v52 = vadd.f32 %v1545_v42, %v1055_v50 }
 0x1ce   :  { %v1060_v54 = vsel %vm1059_vm6, %v1545_v42, %v1056_v52 }
 0x1cf   :  { %v1065_v55 = vsel %vm1062_vm7, %v1064_v53, %v1060_v54 }
 0x1d0   :  { %1068 = vst [vmem:[#allocation11 + $0x8] sm:$0xff] %v1065_v55 }
 0x1d1   :  { %1081 = dma.vmem_to_hbm [thread:$0]  %s1074_s30, 256, %s1076_s10, [#allocation4], %s1702_s13, %s1702_s13, %s1703_s14  }
 0x1d2   :  { %1696 = dma.done.wait [#allocation4], 256  }
 0x1d3   :  { %1697 = vsyncadd [#allocation4], 4294967040 }
 0x1d4   :  { %1086 = vsyncpa [#allocation3], 1 }
 0x1d5   :  { %1087 = vsyncpa [#allocation6], 1 }
 0x1d6   :  { %1088 = vsyncpa [#allocation9], 1 }
 0x1d7   :  { %1089 = vsyncpa [#allocation4], 1 }

</bundles_post_ra>
